<compile_context>
chip_gen: v7x
topology: tpu7x:2x2x1
jax: 0.10.0
libtpu: 0.0.40
codegen_flags: <defaults>
</compile_context>

<pallas_src>
import functools

import jax
import jax.numpy as jnp
from jax import lax
from jax.experimental import pallas as pl
from jax.experimental.pallas import tpu as pltpu


# ---------------------------------------------------------------------------
# Chip-aware configuration
# ---------------------------------------------------------------------------
def _chip_config():
    """VMEM limit and per-step x-block budget, derived from physical VMEM."""
    vmem_cap = 128 * 1024 * 1024
    try:
        vmem_cap = int(pltpu.get_tpu_info().vmem_capacity_bytes)
    except Exception:
        pass
    if vmem_cap <= 64 * 1024 * 1024:
        # v7x: only 64 MiB physical VMEM per TensorCore -> stay conservative.
        return {
            "vmem_limit": 48 * 1024 * 1024,
            "x_block_budget": 3 * 1024 * 1024,
            "whole_n_max_block": 6 * 1024 * 1024,
        }
    # v5e / v6e: 128 MiB physical VMEM; scoped default (16/32 MiB) is too small,
    # so set the limit explicitly and use a generous multi-MiB block budget.
    return {
        "vmem_limit": 64 * 1024 * 1024,
        "x_block_budget": 4 * 1024 * 1024,
        "whole_n_max_block": 8 * 1024 * 1024,
    }


def _choose_tile_d(n, d, itemsize, budget_bytes):
    """Lane-dense D tile for the whole-N path.

    Targets an x block of ~budget_bytes (dtype-aware), multiple of 128 lanes,
    and guarantees >= 2 D tiles when d >= 129 so v7x's two TensorCores both
    get work on the "parallel" grid axis.
    """
    if d <= 128:
        return d  # full-extent lane dim is always legal
    per_lane_bytes = max(n, 1) * itemsize
    tile = int(budget_bytes // per_lane_bytes)
    tile = max(128, (tile // 128) * 128)
    # Ensure at least 2 D tiles (near-zero cost on single-TC chips).
    tile = min(tile, max(128, (d // 2 // 128) * 128))
    if tile >= d:
        return d
    return tile


def _choose_two_pass_tiles(n, d, itemsize, budget_bytes):
    """(tile_n, tile_d) for the large-N two-pass path."""
    if d <= 128:
        tile_d = d
    else:
        tile_d = min(max((d // 2 // 128) * 128, 128), 512)
    tile_n = int(budget_bytes // (max(tile_d, 1) * itemsize))
    tile_n = max(8, (tile_n // 8) * 8)
    if tile_n >= n:
        tile_n = n  # full extent is always legal
    return tile_n, tile_d


# ---------------------------------------------------------------------------
# Kernels
# ---------------------------------------------------------------------------
def _bn_whole_n_kernel(eps, x_ref, gamma_ref, beta_ref, xhat_ref, logv_ref):
    """One (N, TILE_D) column block: batch stats + normalize + affine."""
    x = x_ref[...].astype(jnp.float32)                      # (N, TILE_D)
    n = x.shape[0]

    m = jnp.mean(x, axis=0, keepdims=True)                  # (1, TILE_D)
    # Two-pass centered variance (stable).  The (x - m) temporary dies after
    # the reduction instead of staying live across rsqrt/exp (VMEM saving).
    # NOTE: n == 1 yields 0/0 = NaN, exactly like torch.var(dim=0) unbiased.
    v = jnp.sum(jnp.square(x - m), axis=0, keepdims=True) / jnp.float32(n - 1)
    v = v + jnp.float32(eps)                                 # (1, TILE_D)

    gamma = gamma_ref[...].astype(jnp.float32)               # (1, TILE_D)
    beta = beta_ref[...].astype(jnp.float32)                 # (1, TILE_D)

    # exp / rsqrt / log go to the EUP slot; computed once per D tile.
    scale = lax.rsqrt(v) * jnp.exp(gamma)                    # (1, TILE_D)
    # Recompute (x - m) in the store expression (free VPU filler, mem-bound).
    xhat_ref[...] = ((x - m) * scale + beta).astype(xhat_ref.dtype)

    # Lane-dense per-feature log-variance; summed into log_det by the wrapper.
    logv_ref[...] = jnp.log(v)


def _bn_stats_kernel(eps, n_total, x_ref, gamma_ref, beta_ref,
                     scale_ref, shift_ref, logv_ref, sum_acc, sq_acc):
    """Large-N stats pass: accumulate sum / sum-of-squares over N tiles."""
    ni = pl.program_id(1)
    tile_n = x_ref.shape[0]

    @pl.when(ni == 0)
    def _():
        sum_acc[...] = jnp.zeros_like(sum_acc)
        sq_acc[...] = jnp.zeros_like(sq_acc)

    x = x_ref[...].astype(jnp.float32)                       # (TILE_N, TILE_D)
    # Mask rows past the true batch size (ragged last N tile reads OOB pad).
    row = lax.broadcasted_iota(jnp.int32, x.shape, 0) + ni * tile_n
    x = jnp.where(row < n_total, x, jnp.float32(0.0))

    sum_acc[...] += jnp.sum(x, axis=0, keepdims=True)
    sq_acc[...] += jnp.sum(x * x, axis=0, keepdims=True)

    @pl.when(ni == pl.num_programs(1) - 1)
    def _():
        m = sum_acc[...] * jnp.float32(1.0 / n_total)
        # Unbiased variance from f32-accumulated sum / sum-of-squares.
        v = (sq_acc[...] - jnp.float32(n_total) * m * m) / jnp.float32(n_total - 1)
        v = jnp.maximum(v, jnp.float32(0.0)) + jnp.float32(eps)

        gamma = gamma_ref[...].astype(jnp.float32)
        beta = beta_ref[...].astype(jnp.float32)
        s = lax.rsqrt(v) * jnp.exp(gamma)
        scale_ref[...] = s
        shift_ref[...] = beta - m * s      # x*scale + shift == (x-m)/sqrt(v)*e^g + b
        logv_ref[...] = jnp.log(v)


def _bn_normalize_kernel(x_ref, scale_ref, shift_ref, xhat_ref):
    """Large-N normalize pass: pure elementwise affine, fully streaming."""
    x = x_ref[...].astype(jnp.float32)
    xhat_ref[...] = (x * scale_ref[...] + shift_ref[...]).astype(xhat_ref.dtype)


# ---------------------------------------------------------------------------
# Wrapper
# ---------------------------------------------------------------------------
def batch_norm_layer_forward(x, gamma, beta, eps=1e-5, *,
                             tile_d=None, tile_n=None, force_two_pass=False):
    """Pallas implementation of BatchNormLayer.forward (training mode).

    Args:
      x:     (N, D) array (f32 or bf16; compute is f32)
      gamma: (1, D)
      beta:  (1, D)
    Returns:
      (x_hat, log_det): x_hat (N, D) in x.dtype, log_det scalar f32.
    """
    n, d = x.shape
    itemsize = jnp.dtype(x.dtype).itemsize
    cfg = _chip_config()

    use_two_pass = force_two_pass or (
        n * min(d, 128) * itemsize > cfg["whole_n_max_block"])

    if not use_two_pass:
        # ----- whole-N column path: x read once, x_hat written once -----
        td = tile_d if tile_d is not None else _choose_tile_d(
            n, d, itemsize, cfg["x_block_budget"])
        td = min(td, d)
        num_tiles = pl.cdiv(d, td)

        kernel = functools.partial(_bn_whole_n_kernel, eps)
        cost = pl.CostEstimate(
            flops=int(8 * n * d),
            transcendentals=int(3 * d),
            bytes_accessed=int(2 * n * d * itemsize + 4 * d * 4),
        )

        x_hat, logv = pl.pallas_call(
            kernel,
            out_shape=(
                jax.ShapeDtypeStruct((n, d), x.dtype),
                jax.ShapeDtypeStruct((1, d), jnp.float32),
            ),
            grid=(num_tiles,),
            in_specs=[
                pl.BlockSpec((n, td), lambda i: (0, i)),     # x column block
                pl.BlockSpec((1, td), lambda i: (0, i)),     # gamma
                pl.BlockSpec((1, td), lambda i: (0, i)),     # beta
            ],
            out_specs=(
                pl.BlockSpec((n, td), lambda i: (0, i)),     # x_hat
                pl.BlockSpec((1, td), lambda i: (0, i)),     # log(v)
            ),
            compiler_params=pltpu.CompilerParams(
                dimension_semantics=("parallel",),
                vmem_limit_bytes=cfg["vmem_limit"],
            ),
            cost_estimate=cost,
        )(x, gamma, beta)

    else:
        # ----- large-N fallback: stats pass + normalize pass -----
        auto_tn, auto_td = _choose_two_pass_tiles(
            n, d, itemsize, cfg["x_block_budget"])
        tn = tile_n if tile_n is not None else auto_tn
        td = tile_d if tile_d is not None else auto_td
        tn = min(tn, n)
        td = min(td, d)
        n_tiles = pl.cdiv(n, tn)
        d_tiles = pl.cdiv(d, td)

        stats_kernel = functools.partial(_bn_stats_kernel, eps, n)
        scale, shift, logv = pl.pallas_call(
            stats_kernel,
            out_shape=(
                jax.ShapeDtypeStruct((1, d), jnp.float32),   # scale
                jax.ShapeDtypeStruct((1, d), jnp.float32),   # shift
                jax.ShapeDtypeStruct((1, d), jnp.float32),   # log(v)
            ),
            grid=(d_tiles, n_tiles),
            in_specs=[
                pl.BlockSpec((tn, td), lambda di, ni: (ni, di)),   # x block
                pl.BlockSpec((1, td), lambda di, ni: (0, di)),     # gamma
                pl.BlockSpec((1, td), lambda di, ni: (0, di)),     # beta
            ],
            out_specs=(
                pl.BlockSpec((1, td), lambda di, ni: (0, di)),
                pl.BlockSpec((1, td), lambda di, ni: (0, di)),
                pl.BlockSpec((1, td), lambda di, ni: (0, di)),
            ),
            scratch_shapes=[
                pltpu.VMEM((1, td), jnp.float32),            # sum accumulator
                pltpu.VMEM((1, td), jnp.float32),            # sum-of-squares
            ],
            compiler_params=pltpu.CompilerParams(
                dimension_semantics=("parallel", "arbitrary"),
                vmem_limit_bytes=cfg["vmem_limit"],
            ),
            cost_estimate=pl.CostEstimate(
                flops=int(4 * n * d),
                transcendentals=int(3 * d),
                bytes_accessed=int(n * d * itemsize + 5 * d * 4),
            ),
        )(x, gamma, beta)

        x_hat = pl.pallas_call(
            _bn_normalize_kernel,
            out_shape=jax.ShapeDtypeStruct((n, d), x.dtype),
            grid=(d_tiles, n_tiles),
            in_specs=[
                pl.BlockSpec((tn, td), lambda di, ni: (ni, di)),   # x block
                pl.BlockSpec((1, td), lambda di, ni: (0, di)),     # scale
                pl.BlockSpec((1, td), lambda di, ni: (0, di)),     # shift
            ],
            out_specs=pl.BlockSpec((tn, td), lambda di, ni: (ni, di)),
            compiler_params=pltpu.CompilerParams(
                dimension_semantics=("parallel", "parallel"),
                vmem_limit_bytes=cfg["vmem_limit"],
            ),
            cost_estimate=pl.CostEstimate(
                flops=int(2 * n * d),
                transcendentals=0,
                bytes_accessed=int(2 * n * d * itemsize + 2 * d * 4),
            ),
        )(x, scale, shift)

    # Tiny D-length reduction finished outside the kernel (avoids a (1,1)
    # masked single-lane store + in-kernel cross-lane reduce per grid step,
    # and keeps ragged-D OOB lanes out of the sum).
    log_det = jnp.sum(gamma.astype(jnp.float32) - 0.5 * logv)
    return x_hat, log_det


# ---------------------------------------------------------------------------
# Pure-JAX reference (mirrors the PyTorch module, training mode)
# ---------------------------------------------------------------------------
def _reference_forward(x, gamma, beta, eps=1e-5):
    xf = x.astype(jnp.float32)
    m = jnp.mean(xf, axis=0)
    v = jnp.var(xf, axis=0, ddof=1) + eps
    x_hat = (xf - m) / jnp.sqrt(v)
    x_hat = x_hat * jnp.exp(gamma.astype(jnp.float32)) + beta.astype(jnp.float32)
    log_det = jnp.sum(gamma.astype(jnp.float32) - 0.5 * jnp.log(v))
    return x_hat, log_det


if __name__ == "__main__":
    key = jax.random.PRNGKey(0)
    k1, k2, k3, k4 = jax.random.split(key, 4)

    # ---- Test 1: default whole-N path (N=32, D=256 -> 2 lane-dense D tiles) ----
    N, D = 32, 256
    x = jax.random.normal(k1, (N, D), dtype=jnp.float32)
    gamma = 0.1 * jax.random.normal(k2, (1, D), dtype=jnp.float32)
    beta = 0.1 * jax.random.normal(k3, (1, D), dtype=jnp.float32)

    x_hat, log_det = batch_norm_layer_forward(x, gamma, beta)
    jax.block_until_ready((x_hat, log_det))
    x_hat_ref, log_det_ref = _reference_forward(x, gamma, beta)
    assert jnp.allclose(x_hat, x_hat_ref, atol=1e-5, rtol=1e-5), "x_hat mismatch (whole-N)"
    assert jnp.allclose(log_det, log_det_ref, atol=1e-4, rtol=1e-5), "log_det mismatch (whole-N)"

    # ---- Test 2: forced large-N two-pass path (ragged N and ragged D tiles) ----
    N2, D2 = 72, 384
    x2 = jax.random.normal(k4, (N2, D2), dtype=jnp.float32)
    gamma2 = 0.1 * jax.random.normal(k2, (1, D2), dtype=jnp.float32)
    beta2 = 0.1 * jax.random.normal(k3, (1, D2), dtype=jnp.float32)

    x_hat2, log_det2 = batch_norm_layer_forward(
        x2, gamma2, beta2, force_two_pass=True, tile_n=16, tile_d=128)
    jax.block_until_ready((x_hat2, log_det2))
    x_hat2_ref, log_det2_ref = _reference_forward(x2, gamma2, beta2)
    assert jnp.allclose(x_hat2, x_hat2_ref, atol=1e-4, rtol=1e-4), "x_hat mismatch (two-pass)"
    assert jnp.allclose(log_det2, log_det2_ref, atol=1e-3, rtol=1e-4), "log_det mismatch (two-pass)"

    # ---- Test 3: bf16 input exercises the dtype-aware tiling / cast path ----
    x3 = x.astype(jnp.bfloat16)
    x_hat3, log_det3 = batch_norm_layer_forward(x3, gamma, beta)
    jax.block_until_ready((x_hat3, log_det3))
    x_hat3_ref, log_det3_ref = _reference_forward(x3, gamma, beta)
    assert jnp.allclose(x_hat3.astype(jnp.float32), x_hat3_ref, atol=5e-2, rtol=5e-2), \
        "x_hat mismatch (bf16)"
    assert jnp.allclose(log_det3, log_det3_ref, atol=1e-3, rtol=1e-4), "log_det mismatch (bf16)"

    print("KERNEL_OK")
</pallas_src>

<mosaic_0001>
module attributes {stable_mosaic.version = 11 : i64} {
  func.func @_bn_whole_n_kernel(%arg0: i32, %arg1: memref<32x128xf32, #tpu.memory_space<vmem>>, %arg2: memref<1x128xf32, #tpu.memory_space<vmem>>, %arg3: memref<1x128xf32, #tpu.memory_space<vmem>>, %arg4: memref<32x128xf32, #tpu.memory_space<vmem>>, %arg5: memref<1x128xf32, #tpu.memory_space<vmem>>) attributes {dimension_semantics = [#tpu.dimension_semantics<parallel>], iteration_bounds = array<i64: 2>, scalar_prefetch = 0 : i64, scratch_operands = 0 : i64, tpu.core_type = #tpu.core_type<tc>, window_params = [{transform_indices = @transform_0, window_bounds = array<i64: 32, 128>}, {transform_indices = @transform_1, window_bounds = array<i64: 1, 128>}, {transform_indices = @transform_2, window_bounds = array<i64: 1, 128>}, {transform_indices = @transform_3, window_bounds = array<i64: 32, 128>}, {transform_indices = @transform_4, window_bounds = array<i64: 1, 128>}]} {
    %c0 = arith.constant 0 : index
    %c0_0 = arith.constant 0 : index
    %0 = vector.load %arg1[%c0, %c0_0] : memref<32x128xf32, #tpu.memory_space<vmem>>, vector<32x128xf32>
    %cst = arith.constant dense<0.000000e+00> : vector<128xf32>
    %1 = vector.multi_reduction <add>, %0, %cst [0] : vector<32x128xf32> to vector<128xf32>
    %2 = vector.shape_cast %1 : vector<128xf32> to vector<1x128xf32>
    %cst_1 = arith.constant 3.200000e+01 : f32
    %3 = vector.broadcast %cst_1 : f32 to vector<1x128xf32>
    %4 = arith.divf %2, %3 : vector<1x128xf32>
    %5 = vector.broadcast %4 : vector<1x128xf32> to vector<32x128xf32>
    %6 = arith.subf %0, %5 : vector<32x128xf32>
    %7 = arith.mulf %6, %6 : vector<32x128xf32>
    %cst_2 = arith.constant dense<0.000000e+00> : vector<128xf32>
    %8 = vector.multi_reduction <add>, %7, %cst_2 [0] : vector<32x128xf32> to vector<128xf32>
    %9 = vector.shape_cast %8 : vector<128xf32> to vector<1x128xf32>
    %cst_3 = arith.constant 3.100000e+01 : f32
    %10 = vector.broadcast %cst_3 : f32 to vector<1x128xf32>
    %11 = arith.divf %9, %10 : vector<1x128xf32>
    %cst_4 = arith.constant 9.99999974E-6 : f32
    %12 = vector.broadcast %cst_4 : f32 to vector<1x128xf32>
    %13 = arith.addf %11, %12 : vector<1x128xf32>
    %c0_5 = arith.constant 0 : index
    %c0_6 = arith.constant 0 : index
    %14 = vector.load %arg2[%c0_5, %c0_6] : memref<1x128xf32, #tpu.memory_space<vmem>>, vector<1x128xf32>
    %c0_7 = arith.constant 0 : index
    %c0_8 = arith.constant 0 : index
    %15 = vector.load %arg3[%c0_7, %c0_8] : memref<1x128xf32, #tpu.memory_space<vmem>>, vector<1x128xf32>
    %16 = math.rsqrt %13 : vector<1x128xf32>
    %17 = math.exp %14 : vector<1x128xf32>
    %18 = arith.mulf %16, %17 : vector<1x128xf32>
    %19 = vector.broadcast %4 : vector<1x128xf32> to vector<32x128xf32>
    %20 = arith.subf %0, %19 : vector<32x128xf32>
    %21 = vector.broadcast %18 : vector<1x128xf32> to vector<32x128xf32>
    %22 = arith.mulf %20, %21 : vector<32x128xf32>
    %23 = vector.broadcast %15 : vector<1x128xf32> to vector<32x128xf32>
    %24 = arith.addf %22, %23 : vector<32x128xf32>
    %c0_9 = arith.constant 0 : index
    %c0_10 = arith.constant 0 : index
    %25 = vector.load %arg4[%c0_9, %c0_10] : memref<32x128xf32, #tpu.memory_space<vmem>>, vector<32x128xf32>
    tpu.vector_store %arg4[%c0_9, %c0_10], %24 {strides = array<i32>} : memref<32x128xf32, #tpu.memory_space<vmem>>, vector<32x128xf32>,
    %26 = math.log %13 : vector<1x128xf32>
    %c0_11 = arith.constant 0 : index
    %c0_12 = arith.constant 0 : index
    %27 = vector.load %arg5[%c0_11, %c0_12] : memref<1x128xf32, #tpu.memory_space<vmem>>, vector<1x128xf32>
    tpu.vector_store %arg5[%c0_11, %c0_12], %26 {strides = array<i32>} : memref<1x128xf32, #tpu.memory_space<vmem>>, vector<1x128xf32>,
    return
  }
  func.func @transform_0(%arg0: i32) -> (i32, i32) {
    %c0_i32 = arith.constant 0 : i32
    %c0_i32_0 = arith.constant 0 : i32
    return %c0_i32, %arg0 : i32, i32
  }
  func.func @transform_1(%arg0: i32) -> (i32, i32) {
    %c0_i32 = arith.constant 0 : i32
    %c0_i32_0 = arith.constant 0 : i32
    return %c0_i32, %arg0 : i32, i32
  }
  func.func @transform_2(%arg0: i32) -> (i32, i32) {
    %c0_i32 = arith.constant 0 : i32
    %c0_i32_0 = arith.constant 0 : i32
    return %c0_i32, %arg0 : i32, i32
  }
  func.func @transform_3(%arg0: i32) -> (i32, i32) {
    %c0_i32 = arith.constant 0 : i32
    %c0_i32_0 = arith.constant 0 : i32
    return %c0_i32, %arg0 : i32, i32
  }
  func.func @transform_4(%arg0: i32) -> (i32, i32) {
    %c0_i32 = arith.constant 0 : i32
    %c0_i32_0 = arith.constant 0 : i32
    return %c0_i32, %arg0 : i32, i32
  }
}

</mosaic_0001>

<bundles_post_ra>
// kernel: tpu_custom_call.1
= control target key start
LH: loop header
LB: loop body
LE: loop exit
PB: predicated region body
PF: predicated region fallthrough
CT: control target
= control target key end

     0   :  { %s1127_s0 = inlined_call_operand.hbm [shape: f32[32,256], index: 0, kind: input, shape index: {}]   ;;  %s1128_s1 = inlined_call_operand.hbm [shape: f32[1,256], index: 1, kind: input, shape index: {}]   ;;  %s1129_s2 = inlined_call_operand.hbm [shape: f32[1,256], index: 2, kind: input, shape index: {}]   ;;  %s1130_s3 = inlined_call_operand.hbm [shape: f32[32,256], index: 3, kind: output, shape index: {0}]   ;;  %s1131_s4 = inlined_call_operand.hbm [shape: f32[1,256], index: 4, kind: output, shape index: {1}]  }
   0x1   :  { %1136 = sst [smem:[#allocation16_spill]] %s1127_s0 }
   0x2   :  { %1137 = sst [smem:[#allocation17_spill]] %s1128_s1 }
   0x3   :  { %10 = vsyncpa [#allocation3], 0 }
   0x4   :  { %12 = vsyncpa [#allocation3 + $0x1], 0 }
   0x5   :  { %13 = vsyncpa [#allocation6], 0 }
   0x6   :  { %15 = vsyncpa [#allocation6 + $0x1], 0 }
   0x7   :  { %16 = vsyncpa [#allocation4], 0 }
   0x8   :  { %18 = vsyncpa [#allocation4 + $0x1], 0 }
   0x9   :  { %19 = vsyncpa [#allocation10], 0 }
   0xa   :  { %21 = vsyncpa [#allocation10 + $0x1], 0  ;;  %s843_s15 = smov 0   ;;  %s845_s16 = smov 0  }
   0xb   :  { %s847_s17 = smov 0   ;;  %s849_s18 = smov 0  }
   0xc LB: > { %s864_s19 = sadd.s32 4294967295, %s805_s18   ;;  %s524_s20 = sadd.s32 4294967294, %s805_s18   ;;  %s805_s18 = sphi %s849_s18, %s1158_s18   ;;  %s801_s17 = sphi %s847_s17, %s1157_s17   ;;  %s797_s16 = sphi %s845_s16, %s1156_s16   ;;  %s793_s15 = sphi %s843_s15, %s1155_s15  }
   0xd   : > { %s868_s21 = sadd.s32 1, %s805_s18   ;;  %s34_s22 = sadd.s32 1, %s801_s17 }
   0xe   : > { %s31_s23 = ssub.s32 %s805_s18, %s868_s21  ;;  %p41_p0 = scmp.ne.s32.totalorder %s801_s17, %s797_s16 }
   0xf   : > { %p32_p1 = scmp.eq.s32.totalorder %s31_s23, 0  ;;  %p42_p2 = scmp.eq.s32.totalorder %s805_s18, 0 }
  0x10   : > { %p47_p3 = scmp.ne.s32.totalorder %s797_s16, %s793_s15  ;;  %p48_p4 = scmp.eq.s32.totalorder %s864_s19, 0 }
  0x11   : > { %s880_s24 = scalar_select %p32_p1, %s801_s17, %s34_s22  }
  0x12   : > { %p43_p5 = por %p42_p2, %p41_p0  ;;  %p882_p6 = por %p48_p4, %p47_p3 }
  0x13   : > { %1138 = sst [smem:[#allocation15_spill]] %s880_s24  ;;  %p123_p7 = scmp.eq.s32.totalorder %s864_s19, 1 }
  0x14   : > { %s1139_s25 = scalar_select %p882_p6, 1, 0 }
  0x15   : > { %p129_p8 = scmp.eq.s32.totalorder %s524_s20, 1  ;;  %p567_p10 = scmp.lt.s32.totalorder %s805_s18, 2 }
  0x16   : > { %p889_p11 = por %p123_p7, %p41_p0  ;;  %s898_s28 = sand.u32 1, %s801_s17  }
  0x17   : > { %p893_p12 = por %p129_p8, %p47_p3  ;;  %p900_p13 = pnand %p567_p10, %p43_p5 }
  0x18   : > { %s1140_s26 = scalar_select %p889_p11, 1, 0 }
  0x19   : > { %s1141_s27 = scalar_select %p893_p12, 1, 0 }
  0x1a   : > { %s1142_s29 = scalar_select %p900_p13, 1, 0 }
  0x1b   : > { %s195_s30 = sand.u32 1, %s805_s18   ;;  %s1134_s5 = sshll.u32 %s805_s18, 4 }
  0x1c   : > { %s1143_s1 = sld [smem:[#allocation17_spill]]  ;;  %s198_s9 = scalar_lea.vmem [#allocation5], %s898_s28 }
  0x1d   : > { %s205_s10 = sshll.u32 %s198_s9, 4  ;;  %s527_s11 = sshll.u32 %s898_s28, 5  ;;  %s915_s10 = int_to_ptr.vmem [resolvable:$true] %s205_s10 }
  0x1e   : > { %s917_s12 = scalar_lea.sflag [#allocation6], %s195_s30  ;;  %p923_p1 = pneg %p900_p13 }
  0x22   : > { %s911_s8 = scalar_lea.hbm %s1143_s1, %s1134_s5  ;;  %s618_s23 = scalar_lea.hbm %s1143_s1, 32 }
  0x23   : > { %s613_s13 = scalar_lea.hbm %s911_s8, 16  ;;  %p619_p4 = scmp.lt.u32.totalorder %s911_s8, %s1143_s1 }
  0x24   : > { %p614_p0 = scmp.ne.s32.totalorder %s911_s8, %s613_s13  ;;  %p620_p5 = scmp.lt.u32.totalorder %s618_s23, %s613_s13 }
  0x25   : > { %p622_p8 = scmp.lt.u32.totalorder %s613_s13, %s911_s8 }
  0x26   : > { %p616_p2 = pnand %p923_p1, %p614_p0  ;;  %p621_p7 = por %p620_p5, %p619_p4 }
  0x28   : > { %p617_p3 = pneg %p616_p2  ;;  %p623_p10 = por %p622_p8, %p621_p7 }
  0x2a   : > { %p624_p9 = pnand %p623_p10, %p617_p3 }
  0x2c   : > { %627 = shalt.err (!%p624_p9)
}
  0x2d   : > { %s628_s30 = scalar_lea.vmem %s915_s10, 16  ;;  %s807_s9 = smov [#allocation5]  }
  0x2e   : > { %p629_p0 = scmp.ne.s32.totalorder %s915_s10, %s628_s30  ;;  %s633_s20 = sshll.u32 %s807_s9, 4  ;;  %s634_s20 = int_to_ptr.vmem [resolvable:$false] %s633_s20 }
  0x2f   : > { %s635_s22 = scalar_lea.vmem %s634_s20, 32  ;;  %p636_p11 = scmp.lt.s32.totalorder %s915_s10, %s634_s20 }
  0x30   : > { %p631_p2 = pnand %p629_p0, %p923_p1  ;;  %p637_p6 = scmp.lt.s32.totalorder %s635_s22, %s628_s30 }
  0x32   : > { %p632_p12 = pneg %p631_p2  ;;  %p638_p4 = por %p637_p6, %p636_p11 }
  0x34   : > { %p639_p5 = pnand %p638_p4, %p632_p12 }
  0x36   : > { %642 = shalt.err (!%p639_p5)
}
  0x37   : > { %556 = dma.hbm_to_vmem [thread:$0]  (!%p900_p13), %s911_s8, 16, %s915_s10, %s917_s12  }
  0x38   : > { %p531_p9 = scmp.ge.s32.totalorder %s805_s18, 1  ;;  %p227_p3 = scmp.lt.s32.totalorder %s805_s18, 3 }
  0x39   : > { %s528_s23 = sshll.u32 %s805_s18, 7  ;;  %s1146_s0 = sld [smem:[#allocation16_spill]] }
  0x3a   : > { %p949_p7 = pnand %p531_p9, %p227_p3  ;;  %s179_s9 = scalar_lea.vmem [#allocation2], %s527_s11 }
  0x3b   : > { %s185_s20 = sshll.u32 %s179_s9, 4  ;;  %s176_s8 = scalar_lea.sflag [#allocation3], %s898_s28  ;;  %s961_s20 = int_to_ptr.vmem [resolvable:$true] %s185_s20 }
  0x3c   : > { %s1145_s13 = scalar_select %p949_p7, 1, 0 }
  0x3f   : > { %s957_s30 = scalar_lea.hbm %s1146_s0, %s528_s23  ;;  %s648_s23 = scalar_lea.hbm %s1146_s0, 1024 }
  0x40   : > { %s643_s10 = scalar_lea.hbm %s957_s30, 512  ;;  %p649_p8 = scmp.lt.u32.totalorder %s957_s30, %s1146_s0 }
  0x41   : > { %p644_p6 = scmp.ne.s32.totalorder %s957_s30, %s643_s10  ;;  %p650_p10 = scmp.lt.u32.totalorder %s648_s23, %s643_s10 }
  0x42   : > { %p652_p2 = scmp.lt.u32.totalorder %s643_s10, %s957_s30 }
  0x43   : > { %p646_p11 = pnand %p644_p6, %p923_p1  ;;  %p651_p0 = por %p650_p10, %p649_p8 }
  0x45   : > { %p647_p12 = pneg %p646_p11  ;;  %p653_p4 = por %p652_p2, %p651_p0 }
  0x47   : > { %p654_p5 = pnand %p653_p4, %p647_p12 }
  0x49   : > { %657 = shalt.err (!%p654_p5)
}
  0x4a   : > { %s658_s11 = scalar_lea.vmem %s961_s20, 512  ;;  %s808_s5 = smov [#allocation2]  }
  0x4b   : > { %p659_p9 = scmp.ne.s32.totalorder %s961_s20, %s658_s11  ;;  %s663_s9 = sshll.u32 %s808_s5, 4  ;;  %s664_s9 = int_to_ptr.vmem [resolvable:$false] %s663_s9 }
  0x4c   : > { %s665_s22 = scalar_lea.vmem %s664_s9, 1024  ;;  %p666_p11 = scmp.lt.s32.totalorder %s961_s20, %s664_s9 }
  0x4d   : > { %p661_p3 = pnand %p659_p9, %p923_p1  ;;  %p667_p7 = scmp.lt.s32.totalorder %s665_s22, %s658_s11 }
  0x4f   : > { %p662_p6 = pneg %p661_p3  ;;  %p668_p8 = por %p667_p7, %p666_p11 }
  0x51   : > { %p669_p10 = pnand %p668_p8, %p662_p6 }
  0x53   : > { %672 = shalt.err (!%p669_p10)
}
  0x54   : > { %s809_s10 = smov 256   ;;  %s810_s23 = smov 128  }
  0x55   : > { %s811_s6 = smov 8   ;;  %s1147_s7 = sshll.u32 %s805_s18, 4 }
  0x56   : > { %553 = dma.hbm_to_vmem [thread:$0]  (!%p900_p13), %s957_s30, 512, %s961_s20, %s176_s8, %s809_s10, %s810_s23, %s811_s6  }
  0x57   : > { %s992_s11 = scalar_lea.hbm %s1129_s2, %s1147_s7  ;;  %s215_s22 = scalar_lea.vmem [#allocation7], %s898_s28 }
  0x58   : > { %s222_s0 = sshll.u32 %s215_s22, 4  ;;  %s673_s1 = scalar_lea.hbm %s992_s11, 16  ;;  %s223_s0 = int_to_ptr.vmem [resolvable:$true] %s222_s0 }
  0x59   : > { %p674_p7 = scmp.ne.s32.totalorder %s992_s11, %s673_s1  ;;  %s678_s20 = scalar_lea.hbm %s1129_s2, 32 }
  0x5a   : > { %p679_p2 = scmp.lt.u32.totalorder %s992_s11, %s1129_s2  ;;  %p680_p4 = scmp.lt.u32.totalorder %s678_s20, %s673_s1 }
  0x5b   : > { %p676_p12 = pnand %p674_p7, %p923_p1  ;;  %p682_p9 = scmp.lt.u32.totalorder %s673_s1, %s992_s11 }
  0x5c   : > { %p681_p5 = por %p680_p4, %p679_p2 }
  0x5d   : > { %p677_p0 = pneg %p676_p12 }
  0x5e   : > { %p683_p3 = por %p682_p9, %p681_p5 }
  0x60   : > { %p684_p6 = pnand %p683_p3, %p677_p0 }
  0x62   : > { %687 = shalt.err (!%p684_p6)
}
  0x63   : > { %s688_s28 = scalar_lea.vmem %s223_s0, 16  ;;  %s812_s23 = smov [#allocation7]  }
  0x64   : > { %p689_p11 = scmp.ne.s32.totalorder %s223_s0, %s688_s28  ;;  %s693_s6 = sshll.u32 %s812_s23, 4  ;;  %s694_s6 = int_to_ptr.vmem [resolvable:$false] %s693_s6 }
  0x65   : > { %s695_s24 = scalar_lea.vmem %s694_s6, 32  ;;  %p696_p7 = scmp.lt.s32.totalorder %s223_s0, %s694_s6 }
  0x66   : > { %p691_p8 = pnand %p689_p11, %p923_p1  ;;  %p697_p12 = scmp.lt.s32.totalorder %s695_s24, %s688_s28 }
  0x68   : > { %p692_p10 = pneg %p691_p8  ;;  %p698_p13 = por %p697_p12, %p696_p7 }
  0x6a   : > { %p699_p2 = pnand %p698_p13, %p692_p10 }
  0x6c   : > { %702 = shalt.err (!%p699_p2)
}
  0x6d   : > { %p1148_p4 = scmp.ne.s32.totalorder %s1142_s29, 0  ;;  %p1149_p0 = scmp.ne.s32.totalorder %s1145_s13, 0 }
  0x6e   : > { %s1016_s1 = sand.u32 (!%p1149_p0), 1, %s797_s16   ;;  %p1150_p13 = scmp.ne.s32.totalorder (!%p1149_p0), %s1139_s25, 0 }
  0x6f   : > { %559 = dma.hbm_to_vmem [thread:$0]  (!%p1148_p4), %s992_s11, 16, %s223_s0, %s917_s12  }
  0x70   : > { %231 = sbr.rel (%p1149_p0) target bundleno = 224 (0xe0), region = 32  ;;  %s532_s14 = sshll.u32 (!%p1149_p0), %s1016_s1, 5 }
  0x71   : > { %s234_s7 = scalar_lea.sflag (!%p1149_p0), [#allocation3], %s1016_s1  ;;  %s237_s5 = scalar_lea.vmem (!%p1149_p0), [#allocation2], %s532_s14 }
  0x77   : > { %776 = dma.done.wait (%p1150_p13), %s234_s7, 512  }
  0x78   : > { %778 = vsyncadd (%p1150_p13), %s234_s7, 4294966784  ;;  %s242_s0 = sand.u32 1, %s864_s19   ;;  %s245_s12 = scalar_lea.vmem [#allocation5], %s1016_s1 }
  0x79   : > { %s243_s29 = scalar_lea.sflag [#allocation6], %s242_s0 }
  0x7a   : > { %780 = dma.done.wait (%p1150_p13), %s243_s29, 32  }
  0x7b   : > { %782 = vsyncadd (%p1150_p13), %s243_s29, 4294967264  ;;  %v290_v0 = vld [vmem:[%s237_s5] sm:$0xff]  ;;  %v291_v1 = vld [vmem:[%s237_s5 + $0x8] sm:$0xff]  ;;  %v331_v35 = vlaneseq  ;;  %s289_s25 = scalar_lea.vmem [#allocation9], %s1016_s1  ;;  %s537_s9 = sshll.u32 %s864_s19, 4 }
  0x7c   : > { %v292_v2 = vld [vmem:[%s237_s5 + $0x10] sm:$0xff]  ;;  %v294_v3 = vadd.f32 %v291_v1, %v290_v0  ;;  %v293_v4 = vld [vmem:[%s237_s5 + $0x18] sm:$0xff]  ;;  %v325_v29 = vld [vmem:[%s245_s12] sm:$0x1]  ;;  %s389_s13 = sshll.u32 %s289_s25, 4  ;;  %s1038_s11 = scalar_lea.vmem [#allocation8], %s532_s14  ;;  %s1041_s13 = int_to_ptr.vmem [resolvable:$true] %s389_s13 }
  0x7d   : > { %v328_v32 = vmul.f32 1.442695, %v325_v29  ;;  %v332_v36 = vshrl.u32 %v331_v35, 7  ;;  %s373_s22 = sshll.u32 %s1038_s11, 4  ;;  %s1046_s8 = scalar_lea.hbm %s1131_s4, %s537_s9  ;;  %s1050_s22 = int_to_ptr.vmem [resolvable:$true] %s373_s22 }
  0x7e   : > { %v295_v5 = vadd.f32 %v294_v3, %v292_v2  ;;  %s536_s10 = sshll.u32 %s864_s19, 7  ;;  %s253_s28 = scalar_lea.vmem [#allocation7], %s1016_s1 }
  0x7f   : > { %607 = vpow2.f32 %v328_v32  ;;  %v333_v38 = vsub.s32 0, %v332_v36  ;;  %v534_v44 = vld [vmem:[%s253_s28] ss:$0 sm:$0xff]  ;;  %s362_s23 = scalar_lea.sflag [#allocation10], %s1016_s1  ;;  %s703_s6 = scalar_lea.vmem %s1041_s13, 16 }
  0x80   : > { %v296_v6 = vadd.f32 %v295_v5, %v293_v4  ;;  %p704_p1 = scmp.ne.s32.totalorder %s1041_s13, %s703_s6  ;;  %p1151_p5 = scmp.ne.s32.totalorder %s1140_s26, 0 }
  0x81   : > { %s813_s24 = smov [#allocation9]  }
  0x82   : > { %v297_v7 = vrot.slane %v296_v6, 4  ;;  %p705_p9 = pnand %p704_p1, %p1151_p5  ;;  %s707_s14 = sshll.u32 %s813_s24, 4  ;;  %s708_s14 = int_to_ptr.vmem [resolvable:$false] %s707_s14 }
  0x83   : > { %s709_s7 = scalar_lea.vmem %s708_s14, 32  ;;  %p710_p6 = scmp.lt.s32.totalorder %s1041_s13, %s708_s14 }
  0x84   : > { %v298_v8 = vadd.f32 %v297_v7, %v296_v6  ;;  %p706_p3 = pneg %p705_p9  ;;  %p711_p11 = scmp.lt.s32.totalorder %s709_s7, %s703_s6 }
  0x86   : > { %v299_v9 = vrot.slane %v298_v8, 2  ;;  %p712_p8 = por %p711_p11, %p710_p6 }
  0x88   : > { %v300_v10 = vadd.f32 %v299_v9, %v298_v8  ;;  %p713_p10 = pnand %p712_p8, %p706_p3 }
  0x89   : > { %v608_v37 = vpop.eup %607 }
  0x8a   : > { %v301_v11 = vrot.slane %v300_v10, 1 }
  0x8c   : > { %v302_v12 = vadd.f32 %v301_v11, %v300_v10 }
  0x8e   : > { %v304_v13 = vmul.f32 0.03125, %v302_v12 }
  0x90   : > { %v305_v14 = vsub.f32 %v290_v0, %v304_v13  ;;  %v306_v15 = vsub.f32 %v291_v1, %v304_v13  ;;  %v307_v16 = vsub.f32 %v292_v2, %v304_v13  ;;  %v308_v17 = vsub.f32 %v293_v4, %v304_v13 }
  0x92   : > { %v309_v18 = vmul.f32 %v305_v14, %v305_v14  ;;  %v310_v19 = vmul.f32 %v306_v15, %v306_v15  ;;  %v311_v20 = vmul.f32 %v307_v16, %v307_v16  ;;  %v312_v21 = vmul.f32 %v308_v17, %v308_v17 }
  0x94   : > { %v313_v22 = vadd.f32 %v310_v19, %v309_v18 }
  0x96   : > { %v314_v23 = vadd.f32 %v313_v22, %v311_v20 }
  0x98   : > { %v315_v24 = vadd.f32 %v314_v23, %v312_v21 }
  0x9a   : > { %v316_v25 = vrot.slane %v315_v24, 4 }
  0x9c   : > { %v317_v26 = vadd.f32 %v316_v25, %v315_v24 }
  0x9e   : > { %v318_v27 = vrot.slane %v317_v26, 2 }
  0xa0   : > { %v319_v28 = vadd.f32 %v318_v27, %v317_v26 }
  0xa2   : > { %v320_v30 = vrot.slane %v319_v28, 1 }
  0xa4   : > { %v321_v31 = vadd.f32 %v320_v30, %v319_v28 }
  0xa6   : > { %v323_v33 = vmul.f32 0.032258064, %v321_v31 }
  0xa8   : > { %v324_v34 = vadd.f32 1e-05, %v323_v33 }
  0xaa   : > { %609 = vrsqrt.f32 %v324_v34 }
  0xab   : > { %611 = vlog2.f32 %v324_v34 }
  0xb4   : > { %v610_v39 = vpop.eup %609 }
  0xb5   : > { %v612_v40 = vpop.eup %611  ;;  %v330_v41 = vmul.f32 %v610_v39, %v608_v37 }
  0xb6   : > { %v354_v42 = vmul.f32 0.6931472, %v612_v40 }
  0xb7   : > { %v334_v43 = vrot.slane %v330_v41, %v333_v38 }
  0xb8   : > { %355 = vst [vmem:[%s289_s25] sm:$0x1] %v354_v42 }
  0xb9   : > { %v335_v45 = vmul.f32 %v334_v43, %v305_v14  ;;  %v336_v46 = vmul.f32 %v334_v43, %v306_v15  ;;  %v337_v47 = vmul.f32 %v334_v43, %v307_v16  ;;  %v338_v48 = vmul.f32 %v334_v43, %v308_v17 }
  0xba   : > { %716 = shalt.err (!%p713_p10)
}
  0xbb   : > { %s717_s5 = scalar_lea.hbm %s1046_s8, 16  ;;  %s721_s12 = scalar_lea.hbm %s1131_s4, 32 }
  0xbc   : > { %p718_p7 = scmp.ne.s32.totalorder %s1046_s8, %s717_s5  ;;  %p722_p4 = scmp.lt.u32.totalorder %s1046_s8, %s1131_s4 }
  0xbd   : > { %p723_p0 = scmp.lt.u32.totalorder %s721_s12, %s717_s5  ;;  %p725_p1 = scmp.lt.u32.totalorder %s717_s5, %s1046_s8 }
  0xbe   : > { %p719_p12 = pnand %p718_p7, %p1151_p5 }
  0xbf   : > { %p724_p13 = por %p723_p0, %p722_p4 }
  0xc0   : > { %p720_p2 = pneg %p719_p12 }
  0xc1   : > { %p726_p9 = por %p725_p1, %p724_p13 }
  0xc3   : > { %p727_p3 = pnand %p726_p9, %p720_p2 }
  0xc5   : > { %730 = shalt.err (!%p727_p3)
}
  0xc6   : > { %547 = dma.vmem_to_hbm [thread:$0]  (%p1151_p5), %s1041_s13, 16, %s1046_s8, %s362_s23   ;;  %v345_v49 = vadd.f32 %v534_v44, %v335_v45  ;;  %v346_v50 = vadd.f32 %v534_v44, %v336_v46  ;;  %v347_v51 = vadd.f32 %v534_v44, %v337_v47  ;;  %v348_v52 = vadd.f32 %v534_v44, %v338_v48 }
  0xc7   : > { %s1079_s28 = scalar_lea.hbm %s1130_s3, %s536_s10  ;;  %s357_s6 = scalar_lea.sflag [#allocation4], %s1016_s1 }
  0xc8   : > { %349 = vst [vmem:[%s1038_s11] sm:$0xff] %v345_v49  ;;  %350 = vst [vmem:[%s1038_s11 + $0x8] sm:$0xff] %v346_v50  ;;  %s731_s24 = scalar_lea.vmem %s1050_s22, 512  ;;  %s814_s19 = smov [#allocation8]  }
  0xc9   : > { %351 = vst [vmem:[%s1038_s11 + $0x10] sm:$0xff] %v347_v51  ;;  %352 = vst [vmem:[%s1038_s11 + $0x18] sm:$0xff] %v348_v52  ;;  %p732_p6 = scmp.ne.s32.totalorder %s1050_s22, %s731_s24  ;;  %s735_s13 = sshll.u32 %s814_s19, 4  ;;  %s736_s13 = int_to_ptr.vmem [resolvable:$false] %s735_s13 }
  0xca   : > { %s737_s8 = scalar_lea.vmem %s736_s13, 1024  ;;  %p738_p10 = scmp.lt.s32.totalorder %s1050_s22, %s736_s13 }
  0xcb   : > { %p733_p11 = pnand %p732_p6, %p1151_p5  ;;  %p739_p7 = scmp.lt.s32.totalorder %s737_s8, %s731_s24 }
  0xcd   : > { %p734_p8 = pneg %p733_p11  ;;  %p740_p12 = por %p739_p7, %p738_p10 }
  0xcf   : > { %p741_p2 = pnand %p740_p12, %p734_p8 }
  0xd1   : > { %744 = shalt.err (!%p741_p2)
}
  0xd2   : > { %s745_s11 = scalar_lea.hbm %s1079_s28, 512  ;;  %s749_s14 = scalar_lea.hbm %s1130_s3, 1024 }
  0xd3   : > { %p746_p4 = scmp.ne.s32.totalorder %s1079_s28, %s745_s11  ;;  %p750_p1 = scmp.lt.u32.totalorder %s1079_s28, %s1130_s3 }
  0xd4   : > { %p751_p9 = scmp.lt.u32.totalorder %s749_s14, %s745_s11  ;;  %p753_p6 = scmp.lt.u32.totalorder %s745_s11, %s1079_s28 }
  0xd5   : > { %p747_p0 = pnand %p746_p4, %p1151_p5 }
  0xd6   : > { %p752_p3 = por %p751_p9, %p750_p1 }
  0xd7   : > { %p748_p13 = pneg %p747_p0 }
  0xd8   : > { %p754_p11 = por %p753_p6, %p752_p3 }
  0xda   : > { %p755_p8 = pnand %p754_p11, %p748_p13 }
  0xdc   : > { %758 = shalt.err (!%p755_p8)
}
  0xdd   : > { %s815_s0 = smov 128   ;;  %s816_s29 = smov 256  }
  0xde   : > { %s817_s12 = smov 8  }
  0xdf   : > { %546 = dma.vmem_to_hbm [thread:$0]  (%p1151_p5), %s1050_s22, 512, %s1079_s28, %s357_s6, %s815_s0, %s816_s29, %s817_s12  }
  0xe0 PF: > { %s401_s25 = sand.u32 1, %s793_s15   ;;  %p1152_p10 = scmp.ne.s32.totalorder %s1141_s27, 0 }
  0xe1   : > { %p1153_p7 = scmp.ge.s32.totalorder %s805_s18, 2  ;;  %s402_s9 = scalar_lea.sflag [#allocation4], %s401_s25 }
  0xe3   : > { %p561_p12 = pnand %p1153_p7, %p1152_p10 }
  0xe5   : > { %784 = dma.done.wait (!%p561_p12), %s402_s9, 512  }
  0xe6   : > { %786 = vsyncadd (!%p561_p12), %s402_s9, 4294966784  ;;  %s411_s30 = scalar_lea.sflag [#allocation10], %s401_s25 }
  0xe7   : > { %788 = dma.done.wait (!%p561_p12), %s411_s30, 16  }
  0xe8   : > { %790 = vsyncadd (!%p561_p12), %s411_s30, 4294967280  ;;  %s1154_s26 = sld [smem:[#allocation15_spill]]  ;;  %p24_p5 = scmp.ge.s32.totalorder %s868_s21, 4  }
  0xe9   : > { %s1155_s15 = smov %s797_s16  ;;  %s1156_s16 = smov %s801_s17 }
  0xea   : > { %s1158_s18 = smov %s868_s21  ;;  %26 = sbr.rel (!%p24_p5) target bundleno = 12 (0xc), region = 118 }
  0xee   : > { %s1157_s17 = smov %s1154_s26 }
  0xf1   :  { %415 = vsyncpa [#allocation3], 1 }
  0xf2   :  { %417 = vsyncpa [#allocation3 + $0x1], 1 }
  0xf3   :  { %418 = vsyncpa [#allocation6], 1 }
  0xf4   :  { %420 = vsyncpa [#allocation6 + $0x1], 1 }
  0xf5   :  { %421 = vsyncpa [#allocation4], 1 }
  0xf6   :  { %423 = vsyncpa [#allocation4 + $0x1], 1 }
  0xf7   :  { %424 = vsyncpa [#allocation10], 1 }
  0xf8   :  { %426 = vsyncpa [#allocation10 + $0x1], 1 }

</bundles_post_ra>
